<compile_context>
chip_gen: v7x
topology: tpu7x:2x2x1
jax: 0.10.0
libtpu: 0.0.40
codegen_flags: <defaults>
</compile_context>

<pallas_src>
import functools

import jax
import jax.numpy as jnp
from jax.experimental import pallas as pl
from jax.experimental.pallas import tpu as pltpu


def _round_up(v, m):
    return ((v + m - 1) // m) * m


def _gating_kernel(x_ref, w_ref, b_ref, o_ref, *, compute_dtype):
    # x_ref: (TN, H)      token tile in the caller's dtype (cast to MXU dtype here)
    # w_ref: (H, C_pad)   folded weight (w1 @ w2), zero-padded columns, compute dtype
    # b_ref: (1, C_pad)   folded bias in f32 (-1e30 on padded columns)
    # o_ref: (TN, C)      NARROW one-hot output in the caller's dtype
    x = x_ref[...].astype(compute_dtype)
    logits = jnp.dot(x, w_ref[...], preferred_element_type=jnp.float32)
    logits = logits + b_ref[...]                                         # f32
    # First-max index (matches torch.argmax tie-break exactly). Padded columns
    # sit at -1e30 and can never win.  The one-hot build below is only C lanes
    # wide, so the formerly 128-wide iota/compare/store is gone.
    idx = jnp.argmax(logits, axis=-1, keepdims=True).astype(jnp.int32)   # (TN, 1)
    lane = jax.lax.broadcasted_iota(jnp.int32, o_ref.shape, 1)           # (TN, C)
    o_ref[...] = (lane == idx).astype(o_ref.dtype)


def deep_gumbel_gating_forward(x, params, *, num_choices, min_choice=0,
                               tile_n=None, compute_dtype=jnp.bfloat16,
                               vmem_budget_bytes=16 << 20):
    """Eval-mode forward of DeepGumbelGatingNetwork.

    x: (B, S, hidden_dim) float array.
    params: dict with w1 (H, GH), b1 (GH,), w2 (GH, C), b2 (C,)
            (linear weights stored as (in_features, out_features)).
    Returns: (B, S, num_choices + min_choice) one-hot gates in x.dtype.
    """
    B, S, H = x.shape
    C = num_choices
    N = B * S
    out_dtype = x.dtype
    f32 = jnp.float32

    # ---- Fold the two linears (no nonlinearity between them in the module).
    # NOTE: the fold + bf16 MXU path changes float summation order; argmax can
    # differ from the unfolded f32 module on near-tie logits (documented,
    # acceptable for a gating net).
    w_eff = jnp.dot(params["w1"].astype(f32), params["w2"].astype(f32))      # (H, C)
    b_eff = (jnp.dot(params["b1"].astype(f32), params["w2"].astype(f32))
             + params["b2"].astype(f32))                                     # (C,)

    # ---- Pad the weight's choice dim to 128 lanes so the MXU sees a full-width
    # RHS (this matmul/argmax path is the one known to lower cleanly).  Padded
    # columns (zero weight, -1e30 f32 bias) can never win the argmax; only the
    # narrow (N, C) one-hot ever leaves the kernel.
    C_pad = _round_up(max(C, 128), 128)
    cd_bytes = jnp.dtype(compute_dtype).itemsize
    w_pad = jnp.zeros((H, C_pad), f32).at[:, :C].set(w_eff).astype(compute_dtype)
    b_pad = jnp.full((1, C_pad), -1e30, f32).at[0, :C].set(b_eff)

    x2d = x.reshape(N, H)                    # keep caller dtype: no extra HBM pass
    in_bytes = jnp.dtype(x.dtype).itemsize
    out_bytes = jnp.dtype(out_dtype).itemsize

    ALIGN = 32
    if tile_n is None:
        # Honest per-row VMEM: double-buffered x + narrow one-hot, plus the
        # in-kernel f32 logits / int32 argmax temporaries (~8*C_pad bytes).
        per_row = 2 * H * in_bytes + 2 * C * out_bytes + 8 * C_pad + 64
        t = max(ALIGN, min(4096, (vmem_budget_bytes // per_row) // ALIGN * ALIGN))
        t = min(t, _round_up(N, ALIGN))      # don't pad tiny problems to huge tiles
        # Keep the parallel grid deep enough (and even) so a 2-TensorCore chip
        # (v7x) shards it evenly across both cores.
        while t > ALIGN:
            steps = pl.cdiv(N, t)
            if steps >= 8 or (steps >= 4 and steps % 2 == 0):
                break
            t = max(ALIGN, (t // 2) // ALIGN * ALIGN)
        tile_n = t
    else:
        tile_n = max(ALIGN, _round_up(tile_n, ALIGN))

    grid_n = pl.cdiv(N, tile_n)
    N_pad = grid_n * tile_n
    if N_pad != N:
        x2d = jnp.pad(x2d, ((0, N_pad - N), (0, 0)))   # padded rows sliced off below

    # ---- VMEM request tied to actual need + chip capacity (not a fixed grab).
    req = (2 * tile_n * H * in_bytes           # x double buffer
           + 2 * tile_n * C * out_bytes        # narrow one-hot double buffer
           + H * C_pad * cd_bytes + C_pad * 4  # resident folded weight + bias
           + tile_n * C_pad * 4                # in-kernel f32 logits
           + tile_n * 64)                      # argmax / iota temporaries
    try:
        cap = int(getattr(pltpu.get_tpu_info(), "vmem_capacity_bytes", 64 << 20))
    except Exception:
        cap = 64 << 20                         # conservative floor (v7x per-TC)
    vmem_limit = int(min(max(2 * req + (4 << 20), 8 << 20), (cap * 9) // 10))

    kernel = functools.partial(_gating_kernel, compute_dtype=compute_dtype)
    out = pl.pallas_call(
        kernel,
        out_shape=jax.ShapeDtypeStruct((N_pad, C), out_dtype),
        grid_spec=pltpu.PrefetchScalarGridSpec(
            num_scalar_prefetch=0,
            grid=(grid_n,),
            in_specs=[
                pl.BlockSpec((tile_n, H), lambda i: (i, 0)),   # streamed x tile
                pl.BlockSpec((H, C_pad), lambda i: (0, 0)),    # resident folded weight
                pl.BlockSpec((1, C_pad), lambda i: (0, 0)),    # resident folded bias
            ],
            out_specs=pl.BlockSpec((tile_n, C), lambda i: (i, 0)),
        ),
        compiler_params=pltpu.CompilerParams(
            dimension_semantics=("parallel",),
            vmem_limit_bytes=vmem_limit,
        ),
    )(x2d, w_pad, b_pad)

    gates = out[:N]
    # min_choice > 0 prepends zero columns, exactly as the PyTorch module does.
    if min_choice > 0:
        gates = jnp.concatenate(
            [jnp.zeros((N, min_choice), gates.dtype), gates], axis=-1)
    return gates.reshape(B, S, gates.shape[-1])


def init_params(key, hidden_dim, gating_hidden_dim, num_choices, dtype=jnp.float32):
    """Deterministic PyTorch-Linear-style init: U(-1/sqrt(fan_in), 1/sqrt(fan_in))."""
    k1, k2, k3, k4 = jax.random.split(key, 4)
    bound1 = 1.0 / jnp.sqrt(hidden_dim)
    bound2 = 1.0 / jnp.sqrt(gating_hidden_dim)
    return {
        "w1": jax.random.uniform(k1, (hidden_dim, gating_hidden_dim), dtype,
                                 minval=-bound1, maxval=bound1),
        "b1": jax.random.uniform(k2, (gating_hidden_dim,), dtype,
                                 minval=-bound1, maxval=bound1),
        "w2": jax.random.uniform(k3, (gating_hidden_dim, num_choices), dtype,
                                 minval=-bound2, maxval=bound2),
        "b2": jax.random.uniform(k4, (num_choices,), dtype,
                                 minval=-bound2, maxval=bound2),
    }


if __name__ == "__main__":
    # Small shapes consistent with the module's forward (B, S, hidden_dim).
    B, S, HIDDEN, GATING_HIDDEN, NUM_CHOICES = 2, 8, 32, 128, 4

    key = jax.random.PRNGKey(0)
    kx, kp = jax.random.split(key)
    x = jax.random.normal(kx, (B, S, HIDDEN), dtype=jnp.float32)
    params = init_params(kp, HIDDEN, GATING_HIDDEN, NUM_CHOICES)

    fwd = jax.jit(functools.partial(
        deep_gumbel_gating_forward, num_choices=NUM_CHOICES, min_choice=0))
    gates = fwd(x, params)
    jax.block_until_ready(gates)

    # Sanity: valid one-hot rows, and argmax agrees with (a) a like-for-like
    # folded/bf16 reference and (b) the unfolded f32 module math.  The fold /
    # bf16 cast changes float summation order, so bit-exact agreement on
    # near-tie logits is not expected -- a deliberate tolerance for a gating net.
    x2 = x.reshape(-1, HIDDEN)
    w_eff = params["w1"] @ params["w2"]
    b_eff = params["b1"] @ params["w2"] + params["b2"]
    logits_bf16 = jnp.dot(x2.astype(jnp.bfloat16), w_eff.astype(jnp.bfloat16),
                          preferred_element_type=jnp.float32) + b_eff
    ref_bf16 = jax.nn.one_hot(jnp.argmax(logits_bf16, axis=-1), NUM_CHOICES,
                              dtype=x.dtype).reshape(B, S, NUM_CHOICES)
    logits_f32 = (x2 @ params["w1"] + params["b1"]) @ params["w2"] + params["b2"]
    ref_f32 = jax.nn.one_hot(jnp.argmax(logits_f32, axis=-1), NUM_CHOICES,
                             dtype=x.dtype).reshape(B, S, NUM_CHOICES)

    assert gates.shape == (B, S, NUM_CHOICES)
    assert gates.dtype == x.dtype
    assert bool(jnp.all(jnp.sum(gates, axis=-1) == 1.0))
    agree_bf16 = float(jnp.mean(jnp.all(gates == ref_bf16, axis=-1)))
    agree_f32 = float(jnp.mean(jnp.all(gates == ref_f32, axis=-1)))
    assert agree_bf16 >= 0.9, f"argmax agreement (folded bf16 ref) too low: {agree_bf16}"
    assert agree_f32 >= 0.9, f"argmax agreement (unfolded f32 ref) too low: {agree_f32}"

    print("KERNEL_OK")
</pallas_src>

<mosaic_0001>
module attributes {stable_mosaic.version = 11 : i64} {
  func.func @_gating_kernel(%arg0: i32, %arg1: memref<32x32xf32, #tpu.memory_space<vmem>>, %arg2: memref<32x128xbf16, #tpu.memory_space<vmem>>, %arg3: memref<1x128xf32, #tpu.memory_space<vmem>>, %arg4: memref<32x4xf32, #tpu.memory_space<vmem>>) attributes {dimension_semantics = [#tpu.dimension_semantics<parallel>], iteration_bounds = array<i64: 1>, scalar_prefetch = 0 : i64, scratch_operands = 0 : i64, tpu.core_type = #tpu.core_type<tc>, window_params = [{transform_indices = @transform_0, window_bounds = array<i64: 32, 32>}, {pipeline_mode = #tpu.pipeline_mode<synchronous>, transform_indices = @transform_1, window_bounds = array<i64: 32, 128>}, {pipeline_mode = #tpu.pipeline_mode<synchronous>, transform_indices = @transform_2, window_bounds = array<i64: 1, 128>}, {transform_indices = @transform_3, window_bounds = array<i64: 32, 4>}]} {
    %c0 = arith.constant 0 : index
    %c0_0 = arith.constant 0 : index
    %0 = vector.load %arg1[%c0, %c0_0] : memref<32x32xf32, #tpu.memory_space<vmem>>, vector<32x32xf32>
    %1 = arith.truncf %0 : vector<32x32xf32> to vector<32x32xbf16>
    %c0_1 = arith.constant 0 : index
    %c0_2 = arith.constant 0 : index
    %2 = vector.load %arg2[%c0_1, %c0_2] : memref<32x128xbf16, #tpu.memory_space<vmem>>, vector<32x128xbf16>
    %cst = arith.constant dense<0.000000e+00> : vector<32x128xf32>
    %3 = tpu.matmul %1, %2, %cst {dimension_numbers = #tpu.dot_dimension_numbers<[1], [0], [0], [1], [0, 0, 1, 1], [], []>} : vector<32x32xbf16>, vector<32x128xbf16>, vector<32x128xf32> -> vector<32x128xf32>
    %c0_3 = arith.constant 0 : index
    %c0_4 = arith.constant 0 : index
    %4 = vector.load %arg3[%c0_3, %c0_4] : memref<1x128xf32, #tpu.memory_space<vmem>>, vector<1x128xf32>
    %5 = vector.broadcast %4 : vector<1x128xf32> to vector<32x128xf32>
    %6 = arith.addf %3, %5 : vector<32x128xf32>
    %7 = tpu.reduce_index %6 {axis = 1 : i32, kind = #tpu.reduction_kind<arg_max>} : vector<32x128xf32> -> vector<32xi32>
    %8 = vector.shape_cast %7 : vector<32xi32> to vector<32x1xi32>
    %9 = tpu.iota {dimensions = array<i32: 1>} : vector<32x4xi32>
    %10 = vector.broadcast %8 : vector<32x1xi32> to vector<32x4xi32>
    %11 = arith.cmpi eq, %9, %10 : vector<32x4xi32>
    %12 = arith.extui %11 : vector<32x4xi1> to vector<32x4xi32>
    %13 = arith.sitofp %12 : vector<32x4xi32> to vector<32x4xf32>
    %c0_5 = arith.constant 0 : index
    %c0_6 = arith.constant 0 : index
    %14 = vector.load %arg4[%c0_5, %c0_6] : memref<32x4xf32, #tpu.memory_space<vmem>>, vector<32x4xf32>
    tpu.vector_store %arg4[%c0_5, %c0_6], %13 {strides = array<i32>} : memref<32x4xf32, #tpu.memory_space<vmem>>, vector<32x4xf32>,
    return
  }
  func.func @transform_0(%arg0: i32) -> (i32, i32) {
    %c0_i32 = arith.constant 0 : i32
    %c0_i32_0 = arith.constant 0 : i32
    return %arg0, %c0_i32 : i32, i32
  }
  func.func @transform_1(%arg0: i32) -> (i32, i32) {
    %c0_i32 = arith.constant 0 : i32
    %c0_i32_0 = arith.constant 0 : i32
    %c0_i32_1 = arith.constant 0 : i32
    return %c0_i32, %c0_i32_0 : i32, i32
  }
  func.func @transform_2(%arg0: i32) -> (i32, i32) {
    %c0_i32 = arith.constant 0 : i32
    %c0_i32_0 = arith.constant 0 : i32
    %c0_i32_1 = arith.constant 0 : i32
    return %c0_i32, %c0_i32_0 : i32, i32
  }
  func.func @transform_3(%arg0: i32) -> (i32, i32) {
    %c0_i32 = arith.constant 0 : i32
    %c0_i32_0 = arith.constant 0 : i32
    return %arg0, %c0_i32 : i32, i32
  }
}

</mosaic_0001>

<bundles_post_ra>
// kernel: deep_gumbel_gating_forward.1
= control target key start
LH: loop header
LB: loop body
LE: loop exit
PB: predicated region body
PF: predicated region fallthrough
CT: control target
= control target key end

     0   :  { %vm44_vm0 = vcmask 261120   ;;  %v108_v17 = vlaneseq  ;;  %vm122_vm1 = vcmask 31744   ;;  %v155_v21 = vmov 0.0   ;;  %s213_s1 = inlined_call_operand.vmem [shape: bf16[32,128], index: 1, kind: input, shape index: {}]   ;;  %s214_s0 = inlined_call_operand.vmem [shape: f32[32,32], index: 0, kind: input, shape index: {}]   ;;  %s215_s2 = inlined_call_operand.vmem [shape: f32[1,128], index: 2, kind: input, shape index: {}]   ;;  %s216_s3 = inlined_call_operand.vmem [shape: f32[32,4], index: 3, kind: output, shape index: {}]  }
   0x1   :  { %v153_v0 = vld [vmem:[%s213_s1] sm:$0xff]   ;;  %v154_v1 = vld [vmem:[%s213_s1 + $0x8] sm:$0xff]   ;;  %v17_v5 = vld [vmem:[%s214_s0 + $0x10] sm:$0xff] }
   0x2   :  { %144 = vmatprep.subr.bf16.mxu0 %v153_v0  ;;  %v15_v2 = vld [vmem:[%s214_s0] sm:$0xff]  ;;  %v16_v3 = vld [vmem:[%s214_s0 + $0x8] sm:$0xff]  ;;  %v18_v6 = vld [vmem:[%s214_s0 + $0x18] sm:$0xff]  ;;  %v109_v18 = vand.u32 127, %v108_v17 }
   0x3   :  { %145 = vmatpush3.bf16.msra.mxu0 %v153_v0  ;;  %v19_v4 = vpack.c.bf16 %v16_v3, %v15_v2  ;;  %v20_v7 = vpack.c.bf16 %v18_v6, %v17_v5  ;;  %v131_v8 = vld [vmem:[%s215_s2] ss:$0 sm:$0xff] }
   0x4   :  { %146 = vmatprep.subr.bf16.mxu0 %v154_v1 }
   0x5   :  { %148 = vmatprep.mubr.msk.bf16.mxu0 %vm44_vm0, %v19_v4 }
   0x7   :  { %147 = vmatpush3.bf16.msra.mxu0 %v154_v1 }
   0xa   :  { %149 = vmatmul.mubr.msk.bf16.vlgmr.msra.gmra.mrb[0].mxu0 %vm44_vm0, %v20_v7 }
  0xdd   :  { %v150_v9 = vpop.f32.mrb[0].mxu0 }
  0xde   :  { %v85_v10 = vpop.f32.mrb[1].mxu0  ;;  %v94_v11 = vadd.f32 %v150_v9, %v131_v8 }
  0xdf   :  { %v151_v12 = vpop.f32.mrb[2].mxu0  ;;  %v86_v13 = vadd.f32 %v131_v8, %v85_v10 }
  0xe0   :  { %104 = vmax.index.xlane.f32.xlu1 %v94_v11  ;;  %v88_v14 = vpop.f32.mrb[3].mxu0  ;;  %v97_v15 = vadd.f32 %v151_v12, %v131_v8 }
  0xe1   :  { %100 = vmax.index.xlane.f32.xlu0 %v86_v13  ;;  %v89_v16 = vadd.f32 %v131_v8, %v88_v14 }
  0xe4   :  { %106 = vmax.index.xlane.f32.xlu1 %v97_v15 }
  0xe5   :  { %102 = vmax.index.xlane.f32.xlu0 %v89_v16 }
 0x16d   :  { %v105_v19 = vpop.xlane.xlu1 %104 }
 0x16e   :  { %vm112_vm2 = vcmp.eq.s32.totalorder %v109_v18, %v105_v19  ;;  %v101_v20 = vpop.xlane.xlu0 %100 }
 0x16f   :  { %v138_v22 = vsel %vm112_vm2, 1.0, %v155_v21  ;;  %vm110_vm3 = vcmp.eq.s32.totalorder %v109_v18, %v101_v20 }
 0x170   :  { %125 = vst.msk [vmem:[%s216_s3 + $0x10] sm:$0xff] %vm122_vm1, %v138_v22  ;;  %v136_v23 = vsel %vm110_vm3, 1.0, %v155_v21 }
 0x171   :  { %123 = vst.msk [vmem:[%s216_s3] sm:$0xff] %vm122_vm1, %v136_v23  ;;  %v107_v24 = vpop.xlane.xlu1 %106 }
 0x172   :  { %vm113_vm4 = vcmp.eq.s32.totalorder %v109_v18, %v107_v24  ;;  %v103_v25 = vpop.xlane.xlu0 %102 }
 0x173   :  { %v139_v26 = vsel %vm113_vm4, 1.0, %v155_v21  ;;  %vm111_vm5 = vcmp.eq.s32.totalorder %v109_v18, %v103_v25 }
 0x174   :  { %126 = vst.msk [vmem:[%s216_s3 + $0x18] sm:$0xff] %vm122_vm1, %v139_v26  ;;  %v137_v27 = vsel %vm111_vm5, 1.0, %v155_v21 }
 0x175   :  { %124 = vst.msk [vmem:[%s216_s3 + $0x8] sm:$0xff] %vm122_vm1, %v137_v27 }

</bundles_post_ra>
